<compile_context>
chip_gen: v6e
topology: v6e:2x2x1
jax: 0.10.0
libtpu: 0.0.40
codegen_flags: <defaults>
</compile_context>

<pallas_src>
import jax
import jax.numpy as jnp
from jax.experimental import pallas as pl
from jax.experimental.pallas import tpu as pltpu


def _round_up(x, m):
    return ((x + m - 1) // m) * m


def cnn_kernel(x_ref, w_ref, b_ref, o_ref):
    # x_ref: (TB, Lp, CKp)  compact im2col tile (mask column folded in)
    # w_ref: (CKp, Fp)      resident im2col'd weights (+ -1e30 mask row)
    # b_ref: (1, Fp)        resident bias
    # o_ref: (TB, Fp)       lane-dense output
    TB, Lp, CKp = x_ref.shape
    Fp = w_ref.shape[-1]

    # Lp is a multiple of 8, so merging the leading dims is a free reshape;
    # the whole tile goes through one MXU matmul.
    x2d = x_ref[...].reshape(TB * Lp, CKp)
    acc = jnp.dot(x2d, w_ref[...], preferred_element_type=jnp.float32)
    acc = acc.reshape(TB, Lp, Fp)

    # Padded conv positions picked up a -1e30 contribution from the mask
    # column, so they can never win the max -> no iota/where needed.
    mx = jnp.max(acc, axis=1)                                  # (TB, Fp)
    # max(ReLU(a + b)) == ReLU(max(a) + b): bias per-channel, ReLU monotone.
    o_ref[...] = jnp.maximum(mx + b_ref[...], 0.0).astype(o_ref.dtype)


def cnn_forward(x, weight, bias, *, block_b=1024):
    """Conv1d(stride=1, padding=0) -> ReLU -> MaxPool1d(L - K + 1).

    x: (B, C, L) float32, weight: (F, C, K), bias: (F,).
    Returns (B, F, 1), exactly like the PyTorch module.
    """
    B, C, L = x.shape
    F, _, K = weight.shape
    Lout = L - K + 1
    CK = C * K

    # ---- wrapper-side layout plumbing (compact im2col, no 128-lane padding
    # of the input's contraction dim) ----
    # X2D[b, t, c*K + j] = x[b, c, t + j]; W2D[c*K + j, f] = weight[f, c, j]
    cols = jnp.stack([x[:, :, j:j + Lout] for j in range(K)], axis=-1)  # (B,C,Lout,K)
    x2d = cols.transpose(0, 2, 1, 3).reshape(B, Lout, CK)

    Lp = _round_up(Lout, 8)          # sublane multiple -> free in-kernel reshape
    CKp = _round_up(CK + 1, 8)       # +1 mask column; only sublane-aligned (NOT 128)
    Fp = _round_up(F, 128)           # lane-pad output channels (lane-dense stores)

    # Batch tile: full batch when small; otherwise a multiple of 8, capped at
    # block_b, and chosen so the parallel grid has >=2 steps (keeps both v7x
    # TensorCores busy).  Compact tiles are small, so no VMEM concerns.
    if B <= 16:
        TB = B
    else:
        TB = min(block_b, _round_up(pl.cdiv(B, 2), 8))
    Bp = _round_up(B, TB)

    x2d = jnp.pad(x2d, ((0, Bp - B), (0, Lp - Lout), (0, CKp - CK)))
    # Mask column: 1.0 on padded conv positions (t >= Lout), 0.0 elsewhere.
    x2d = x2d.at[:, Lout:, CK].set(1.0)

    w2d = jnp.pad(weight.reshape(F, CK).T, ((0, CKp - CK), (0, Fp - F)))
    # Mask row: large finite negative (not -inf, to avoid 0*inf -> NaN).
    w2d = w2d.at[CK, :].set(-1e30)

    b2d = jnp.pad(bias.reshape(1, F), ((0, 0), (0, Fp - F)))

    out = pl.pallas_call(
        cnn_kernel,
        out_shape=jax.ShapeDtypeStruct((Bp, Fp), x.dtype),
        grid_spec=pltpu.PrefetchScalarGridSpec(
            num_scalar_prefetch=0,
            grid=(Bp // TB,),
            in_specs=[
                # Last two block dims equal the full array dims -> legal
                # without 128-lane padding of the contraction dim.
                pl.BlockSpec((TB, Lp, CKp), lambda i: (i, 0, 0)),
                pl.BlockSpec((CKp, Fp), lambda i: (0, 0)),   # resident weights
                pl.BlockSpec((1, Fp), lambda i: (0, 0)),     # resident bias
            ],
            out_specs=pl.BlockSpec((TB, Fp), lambda i: (i, 0)),
        ),
        compiler_params=pltpu.CompilerParams(
            dimension_semantics=("parallel",)),
    )(x2d, w2d, b2d)

    # Strip lane/batch padding; match PyTorch's (B, F, 1) output layout.
    return out[:B, :F].reshape(B, F, 1)


def _reference(x, weight, bias):
    """Pure-JAX reference of Conv1d -> ReLU -> MaxPool1d(L - K + 1)."""
    B, C, L = x.shape
    F, _, K = weight.shape
    Lout = L - K + 1
    acc = jnp.zeros((B, F, Lout), jnp.float32)
    for j in range(K):
        acc = acc + jnp.einsum("fc,bcl->bfl", weight[:, :, j], x[:, :, j:j + Lout])
    acc = jnp.maximum(acc + bias.reshape(1, F, 1), 0.0)
    return jnp.max(acc, axis=-1, keepdims=True)


if __name__ == "__main__":
    # Small shapes consistent with the module: echar=4, f=8, k=3, mword=16, batch=2
    batch, echar, f, k, mword = 2, 4, 8, 3, 16

    key = jax.random.PRNGKey(0)
    kx, kw, kb = jax.random.split(key, 3)

    x = jax.random.normal(kx, (batch, echar, mword), dtype=jnp.float32)
    # Deterministic parameter init (synthetic, not a checkpoint load).
    weight = jax.random.normal(kw, (f, echar, k), dtype=jnp.float32) * 0.1
    bias = jax.random.normal(kb, (f,), dtype=jnp.float32) * 0.1

    out = jax.block_until_ready(cnn_forward(x, weight, bias))
    ref = _reference(x, weight, bias)

    assert out.shape == (batch, f, 1), out.shape
    assert jnp.allclose(out, ref, atol=1e-4, rtol=1e-4), "mismatch vs reference"

    print("KERNEL_OK")
</pallas_src>

<mosaic_0001>
module attributes {stable_mosaic.version = 11 : i64} {
  func.func @cnn_kernel(%arg0: i32, %arg1: memref<2x16x16xf32, #tpu.memory_space<vmem>>, %arg2: memref<16x128xf32, #tpu.memory_space<vmem>>, %arg3: memref<1x128xf32, #tpu.memory_space<vmem>>, %arg4: memref<2x128xf32, #tpu.memory_space<vmem>>) attributes {dimension_semantics = [#tpu.dimension_semantics<parallel>], iteration_bounds = array<i64: 1>, scalar_prefetch = 0 : i64, scratch_operands = 0 : i64, tpu.core_type = #tpu.core_type<tc>, window_params = [{transform_indices = @transform_0, window_bounds = array<i64: 2, 16, 16>}, {pipeline_mode = #tpu.pipeline_mode<synchronous>, transform_indices = @transform_1, window_bounds = array<i64: 16, 128>}, {pipeline_mode = #tpu.pipeline_mode<synchronous>, transform_indices = @transform_2, window_bounds = array<i64: 1, 128>}, {transform_indices = @transform_3, window_bounds = array<i64: 2, 128>}]} {
    %c0 = arith.constant 0 : index
    %c0_0 = arith.constant 0 : index
    %c0_1 = arith.constant 0 : index
    %0 = vector.load %arg1[%c0, %c0_0, %c0_1] : memref<2x16x16xf32, #tpu.memory_space<vmem>>, vector<2x16x16xf32>
    %1 = vector.shape_cast %0 : vector<2x16x16xf32> to vector<32x16xf32>
    %c0_2 = arith.constant 0 : index
    %c0_3 = arith.constant 0 : index
    %2 = vector.load %arg2[%c0_2, %c0_3] : memref<16x128xf32, #tpu.memory_space<vmem>>, vector<16x128xf32>
    %cst = arith.constant dense<0.000000e+00> : vector<32x128xf32>
    %3 = tpu.matmul %1, %2, %cst {dimension_numbers = #tpu.dot_dimension_numbers<[1], [0], [0], [1], [0, 0, 1, 1], [], []>} : vector<32x16xf32>, vector<16x128xf32>, vector<32x128xf32> -> vector<32x128xf32>
    %4 = vector.shape_cast %3 : vector<32x128xf32> to vector<2x16x128xf32>
    %cst_4 = arith.constant dense<0xFF800000> : vector<2x128xf32>
    %5 = vector.multi_reduction <maximumf>, %4, %cst_4 [1] : vector<2x16x128xf32> to vector<2x128xf32>
    %c0_5 = arith.constant 0 : index
    %c0_6 = arith.constant 0 : index
    %6 = vector.load %arg3[%c0_5, %c0_6] : memref<1x128xf32, #tpu.memory_space<vmem>>, vector<1x128xf32>
    %7 = vector.broadcast %6 : vector<1x128xf32> to vector<2x128xf32>
    %8 = arith.addf %5, %7 : vector<2x128xf32>
    %cst_7 = arith.constant 0.000000e+00 : f32
    %9 = vector.broadcast %cst_7 : f32 to vector<2x128xf32>
    %10 = arith.maximumf %8, %9 : vector<2x128xf32>
    %c0_8 = arith.constant 0 : index
    %c0_9 = arith.constant 0 : index
    %11 = vector.load %arg4[%c0_8, %c0_9] : memref<2x128xf32, #tpu.memory_space<vmem>>, vector<2x128xf32>
    tpu.vector_store %arg4[%c0_8, %c0_9], %10 {strides = array<i32>} : memref<2x128xf32, #tpu.memory_space<vmem>>, vector<2x128xf32>,
    return
  }
  func.func @transform_0(%arg0: i32) -> (i32, i32, i32) {
    %c0_i32 = arith.constant 0 : i32
    %c0_i32_0 = arith.constant 0 : i32
    %c0_i32_1 = arith.constant 0 : i32
    return %arg0, %c0_i32, %c0_i32_0 : i32, i32, i32
  }
  func.func @transform_1(%arg0: i32) -> (i32, i32) {
    %c0_i32 = arith.constant 0 : i32
    %c0_i32_0 = arith.constant 0 : i32
    %c0_i32_1 = arith.constant 0 : i32
    return %c0_i32, %c0_i32_0 : i32, i32
  }
  func.func @transform_2(%arg0: i32) -> (i32, i32) {
    %c0_i32 = arith.constant 0 : i32
    %c0_i32_0 = arith.constant 0 : i32
    %c0_i32_1 = arith.constant 0 : i32
    return %c0_i32, %c0_i32_0 : i32, i32
  }
  func.func @transform_3(%arg0: i32) -> (i32, i32) {
    %c0_i32 = arith.constant 0 : i32
    %c0_i32_0 = arith.constant 0 : i32
    return %arg0, %c0_i32 : i32, i32
  }
}

</mosaic_0001>

<bundles_post_ra>
// kernel: tpu_custom_call.1
= control target key start
LH: loop header
LB: loop body
LE: loop exit
PB: predicated region body
PF: predicated region fallthrough
CT: control target
= control target key end

     0   :  { %8 = vsyncpa [#allocation3], 0  ;;  %s328_s0 = inlined_call_operand.hbm [shape: f32[2,16,16], index: 0, kind: input, shape index: {}]   ;;  %s329_s1 = inlined_call_operand.hbm [shape: f32[16,128], index: 1, kind: input, shape index: {}]   ;;  %s330_s2 = inlined_call_operand.vmem [shape: f32[1,128], index: 2, kind: input, shape index: {}]   ;;  %s331_s3 = inlined_call_operand.hbm [shape: f32[2,128], index: 3, kind: output, shape index: {}]  }
   0x1   :  { %9 = vsyncpa [#allocation6], 0 }
   0x2   :  { %10 = vsyncpa [#allocation4], 0  ;;  %s291_s12 = smov [#allocation2]  }
   0x3   :  { %s16_s13 = sshll.u32 %s291_s12, 4  ;;  %s17_s13 = int_to_ptr.vmem [resolvable:$true] %s16_s13 }
   0x4   :  { %s233_s14 = scalar_lea.vmem %s17_s13, 512  ;;  %p238_p1 = scmp.lt.s32.totalorder %s17_s13, %s17_s13 }
   0x5   :  { %p234_p0 = scmp.ne.s32.totalorder %s17_s13, %s233_s14  ;;  %p239_p2 = scmp.lt.s32.totalorder %s233_s14, %s233_s14 }
   0x7   :  { %p240_p3 = por %p239_p2, %p238_p1 }
   0x9   :  { %p241_p4 = pnand %p240_p3, %p234_p0 }
   0xb   :  { %244 = shalt.err (!%p241_p4)
}
   0xc   :  { %s292_s15 = smov 128   ;;  %s293_s16 = smov 8  }
   0xd   :  { %22 = dma.hbm_to_vmem [thread:$0]  %s328_s0, 512, %s17_s13, [#allocation3], %s292_s15, %s292_s15, %s293_s16  }
   0xe   :  { %s294_s19 = smov [#allocation5]  }
   0xf   :  { %s28_s20 = sshll.u32 %s294_s19, 4  ;;  %s29_s20 = int_to_ptr.vmem [resolvable:$true] %s28_s20 }
  0x10   :  { %s253_s21 = scalar_lea.vmem %s29_s20, 256  ;;  %p258_p6 = scmp.lt.s32.totalorder %s29_s20, %s29_s20 }
  0x11   :  { %p254_p5 = scmp.ne.s32.totalorder %s29_s20, %s253_s21  ;;  %p259_p7 = scmp.lt.s32.totalorder %s253_s21, %s253_s21 }
  0x13   :  { %p260_p8 = por %p259_p7, %p258_p6 }
  0x15   :  { %p261_p9 = pnand %p260_p8, %p254_p5 }
  0x17   :  { %264 = shalt.err (!%p261_p9)
}
  0x18   :  { %34 = dma.hbm_to_vmem [thread:$0]  %s329_s1, 256, %s29_s20, [#allocation6], %s292_s15, %s292_s15, %s293_s16  }
  0x19   :  { %285 = dma.done.wait [#allocation3], 512  }
  0x1a   :  { %286 = vsyncadd [#allocation3], 4294966784 }
  0x1b   :  { %287 = dma.done.wait [#allocation6], 256  }
  0x1c   :  { %288 = vsyncadd [#allocation6], 4294967040  ;;  %v48_v0 = vld [vmem:[#allocation5 + $0x8] sm:$0xff]  ;;  %v47_v1 = vld [vmem:[#allocation5] sm:$0xff]  ;;  %vm49_vm0 = vcmask 130048   ;;  %s295_s24 = smov [#allocation7]  }
  0x1d   :  { %206 = vmatprep.subr.mxu0 %v48_v0  ;;  %216 = vmatprep.subr.mxu1 %v48_v0  ;;  %v43_v2 = vld [vmem:[#allocation2] sm:$0xff]  ;;  %v45_v3 = vld [vmem:[#allocation2 + $0x10] sm:$0xff]  ;;  %v44_v4 = vld [vmem:[#allocation2 + $0x8] sm:$0xff]  ;;  %s185_s25 = sshll.u32 %s295_s24, 4  ;;  %vm175_vm1 = vcmask 1041409   ;;  %s186_s25 = int_to_ptr.vmem [resolvable:$true] %s185_s25 }
  0x1e   :  { %207 = vmatpush3.msra.mxu0 %v48_v0  ;;  %218 = vmatpush3.msra.mxu1 %v48_v0  ;;  %v46_v5 = vld [vmem:[#allocation2 + $0x18] sm:$0xff]  ;;  %v199_v22 = vld [vmem:[%s330_s2] ss:$0 sm:$0xff]  ;;  %s265_s26 = scalar_lea.vmem %s186_s25, 32  ;;  %p270_p11 = scmp.lt.s32.totalorder %s186_s25, %s186_s25 }
  0x1f   :  { %208 = vmatprep.subr.mxu0 %v47_v1  ;;  %217 = vmatprep.subr.mxu1 %v47_v1  ;;  %p266_p10 = scmp.ne.s32.totalorder %s186_s25, %s265_s26  ;;  %p271_p12 = scmp.lt.s32.totalorder %s265_s26, %s265_s26 }
  0x20   :  { %209 = vmatpush3.msra.mxu0 %v47_v1  ;;  %219 = vmatpush3.msra.mxu1 %v47_v1 }
  0x21   :  { %210 = vmatprep.mubr.msk.f32.mxu0 %vm49_vm0, %v43_v2  ;;  %213 = vmatprep.mubr.msk.f32.mxu1 %vm49_vm0, %v45_v3  ;;  %p272_p13 = por %p271_p12, %p270_p11 }
  0x22   :  { %211 = vmatmul.mubr.msk.f32.vlgmr.msra.gmra.mxu0 %vm49_vm0, %v44_v4  ;;  %214 = vmatmul.mubr.msk.f32.vlgmr.msra.gmra.mxu1 %vm49_vm0, %v46_v5 }
  0x23   :  { %p273_p0 = pnand %p272_p13, %p266_p10 }
  0xe2   :  { %v212_v6 = vpop.f32.mrf.mxu0  ;;  %v215_v7 = vpop.f32.mrf.mxu1 }
  0xe4   :  { %v128_v8 = vpop.f32.mrf.mxu0  ;;  %v138_v9 = vpop.f32.mrf.mxu1 }
  0xe5   :  { %v147_v10 = vmax.f32 %v128_v8, %v212_v6  ;;  %v154_v11 = vmax.f32 %v138_v9, %v215_v7 }
  0xe7   :  { %v148_v12 = vrot.slane %v147_v10, 4  ;;  %v155_v13 = vrot.slane %v154_v11, 4 }
  0xe9   :  { %v149_v14 = vmax.f32 %v147_v10, %v148_v12  ;;  %v156_v15 = vmax.f32 %v154_v11, %v155_v13 }
  0xeb   :  { %v150_v16 = vrot.slane %v149_v14, 2  ;;  %v157_v17 = vrot.slane %v156_v15, 2 }
  0xed   :  { %v151_v18 = vmax.f32 %v149_v14, %v150_v16  ;;  %v158_v19 = vmax.f32 %v156_v15, %v157_v17 }
  0xef   :  { %v152_v20 = vrot.slane %v151_v18, 1  ;;  %v159_v21 = vrot.slane %v158_v19, 1 }
  0xf1   :  { %v153_v23 = vmax.f32 %v151_v18, %v152_v20  ;;  %v160_v24 = vmax.f32 %v158_v19, %v159_v21 }
  0xf3   :  { %v168_v25 = vadd.f32 %v199_v22, %v153_v23  ;;  %v169_v26 = vadd.f32 %v199_v22, %v160_v24 }
  0xf5   :  { %v171_v27 = vmax.f32 %v169_v26, 0.0  ;;  %v170_v28 = vmax.f32 %v168_v25, 0.0 }
  0xf7   :  { %v174_v29 = vrot.slane %v171_v27, 7 }
  0xf9   :  { %v176_v30 = vsel %vm175_vm1, %v174_v29, %v170_v28 }
  0xfa   :  { %178 = vst [vmem:[#allocation7] sm:$0x3] %v176_v30 }
  0xfb   :  { %276 = shalt.err (!%p273_p0)
}
  0xfc   :  { %188 = dma.vmem_to_hbm [thread:$0]  %s186_s25, 32, %s331_s3, [#allocation4]  }
  0xfd   :  { %289 = dma.done.wait [#allocation4], 32  }
  0xfe   :  { %290 = vsyncadd [#allocation4], 4294967264 }
  0xff   :  { %192 = vsyncpa [#allocation3], 1 }
 0x100   :  { %193 = vsyncpa [#allocation6], 1 }
 0x101   :  { %194 = vsyncpa [#allocation4], 1 }

</bundles_post_ra>
